<compile_context>
chip_gen: v5e
topology: v5e:2x2
jax: 0.10.0
libtpu: 0.0.40
codegen_flags: <defaults>
</compile_context>

<pallas_src>
import jax
import jax.numpy as jnp
from jax.experimental import pallas as pl
from jax.experimental.pallas import tpu as pltpu


def _round_up(n, m):
    return ((n + m - 1) // m) * m


def _varnet_kernel(x_ref, w1_ref, b1_ref, w2_ref, b2_ref, o_ref):
    # fc1: bf16 x bf16 MXU matmul, f32 accumulation; bias + ReLU in f32 (VPU).
    h = jnp.dot(x_ref[...], w1_ref[...], preferred_element_type=jnp.float32)
    h = jnp.maximum(h + b1_ref[...], 0.0)

    # fc_var: cast activations back to bf16 for the MXU, accumulate in f32.
    z = jnp.dot(h.astype(jnp.bfloat16), w2_ref[...],
                preferred_element_type=jnp.float32)
    z = z + b2_ref[...]

    # ELU(alpha=-1): z if z > 0 else -(exp(z) - 1).
    # exp only on min(z, 0) so the unselected branch never overflows.
    neg_branch = -(jnp.exp(jnp.minimum(z, 0.0)) - 1.0)
    o_ref[...] = jnp.where(z > 0.0, z, neg_branch).astype(o_ref.dtype)


def varnet_forward(x, w1, b1, w2, b2, *, block_m=512):
    """x: (B, input_dim); w1: (input_dim, hidden); w2: (hidden, out_dim // 3).

    Pads all feature dims to 128 lanes, pads/tiles the batch in multiples of
    8 (up to `block_m` rows per tile), runs one Pallas grid over batch tiles,
    and slices the padding back off.
    """
    B, d_in = x.shape
    hidden = w1.shape[1]
    d_out = w2.shape[1]

    LANE = 128
    d_in_p = _round_up(d_in, LANE)
    hid_p = _round_up(hidden, LANE)
    d_out_p = _round_up(d_out, LANE)

    # Row tile: multiple of 8 (sublane), capped by requested block_m; never
    # over-pad tiny batches.
    bm = _round_up(min(block_m, _round_up(B, 8)), 8)
    B_p = _round_up(B, bm)
    grid = (B_p // bm,)

    # Zero-pad to lane-dense shapes; matmul operands go to bf16 (halves DMA
    # bytes, MXU-native), biases stay f32.
    x_p = jnp.zeros((B_p, d_in_p), jnp.bfloat16).at[:B, :d_in].set(
        x.astype(jnp.bfloat16))
    w1_p = jnp.zeros((d_in_p, hid_p), jnp.bfloat16).at[:d_in, :hidden].set(
        w1.astype(jnp.bfloat16))
    b1_p = jnp.zeros((1, hid_p), jnp.float32).at[0, :hidden].set(
        b1.astype(jnp.float32))
    w2_p = jnp.zeros((hid_p, d_out_p), jnp.bfloat16).at[:hidden, :d_out].set(
        w2.astype(jnp.bfloat16))
    b2_p = jnp.zeros((1, d_out_p), jnp.float32).at[0, :d_out].set(
        b2.astype(jnp.float32))

    out = pl.pallas_call(
        _varnet_kernel,
        out_shape=jax.ShapeDtypeStruct((B_p, d_out_p), jnp.float32),
        grid_spec=pltpu.PrefetchScalarGridSpec(
            num_scalar_prefetch=0,
            grid=grid,
            in_specs=[
                pl.BlockSpec((bm, d_in_p), lambda i: (i, 0)),     # x tile
                pl.BlockSpec((d_in_p, hid_p), lambda i: (0, 0)),  # W1 (resident)
                pl.BlockSpec((1, hid_p), lambda i: (0, 0)),       # b1
                pl.BlockSpec((hid_p, d_out_p), lambda i: (0, 0)), # W2 (resident)
                pl.BlockSpec((1, d_out_p), lambda i: (0, 0)),     # b2
            ],
            out_specs=pl.BlockSpec((bm, d_out_p), lambda i: (i, 0)),
        ),
        compiler_params=pltpu.CompilerParams(
            dimension_semantics=("parallel",),  # batch tiles shard across TCs
        ),
    )(x_p, w1_p, b1_p, w2_p, b2_p)

    return out[:B, :d_out]


def _reference(x, w1, b1, w2, b2):
    # Numerically matched reference: bf16 matmul inputs, f32 accumulation and
    # f32 elementwise, same ELU(alpha=-1) formulation as the kernel.
    xb = x.astype(jnp.bfloat16)
    w1b = w1.astype(jnp.bfloat16)
    w2b = w2.astype(jnp.bfloat16)
    h = jnp.maximum(
        jnp.dot(xb, w1b, preferred_element_type=jnp.float32) + b1, 0.0)
    z = jnp.dot(h.astype(jnp.bfloat16), w2b,
                preferred_element_type=jnp.float32) + b2
    return jnp.where(z > 0.0, z, -(jnp.exp(jnp.minimum(z, 0.0)) - 1.0))


if __name__ == "__main__":
    # Shapes consistent with the module: input_dim=32, hidden_dim=64,
    # out_dim=48 -> fc_var emits out_dim // 3 = 16 features per row.
    input_dim, hidden_dim, out_dim = 32, 64, 48
    d_out = out_dim // 3

    key = jax.random.PRNGKey(0)
    kx, k1, k2, k3, k4, kx2 = jax.random.split(key, 6)

    # Deterministic parameter init (uniform, PyTorch-Linear-style bounds).
    lim1 = 1.0 / (input_dim ** 0.5)
    lim2 = 1.0 / (hidden_dim ** 0.5)
    w1 = jax.random.uniform(k1, (input_dim, hidden_dim), jnp.float32, -lim1, lim1)
    b1 = jax.random.uniform(k2, (hidden_dim,), jnp.float32, -lim1, lim1)
    w2 = jax.random.uniform(k3, (hidden_dim, d_out), jnp.float32, -lim2, lim2)
    b2 = jax.random.uniform(k4, (d_out,), jnp.float32, -lim2, lim2)

    # Small batch (single grid step, tile = full padded batch).
    B_small = 16
    x_small = jax.random.normal(kx, (B_small, input_dim), dtype=jnp.float32)
    out_small = jax.block_until_ready(varnet_forward(x_small, w1, b1, w2, b2))
    ref_small = _reference(x_small, w1, b1, w2, b2)
    assert out_small.shape == (B_small, d_out)
    assert jnp.allclose(out_small, ref_small, atol=1e-2, rtol=1e-2), \
        "mismatch vs JAX reference (small batch)"

    # Larger batch: 128-row tiles, 2-step parallel grid (exercises megacore
    # sharding on v7x and the padded-batch slicing path).
    B_big = 256
    x_big = jax.random.normal(kx2, (B_big, input_dim), dtype=jnp.float32)
    out_big = jax.block_until_ready(
        varnet_forward(x_big, w1, b1, w2, b2, block_m=128))
    ref_big = _reference(x_big, w1, b1, w2, b2)
    assert out_big.shape == (B_big, d_out)
    assert jnp.allclose(out_big, ref_big, atol=1e-2, rtol=1e-2), \
        "mismatch vs JAX reference (large batch)"

    print("KERNEL_OK")
</pallas_src>

<mosaic_0001>
module attributes {stable_mosaic.version = 11 : i64} {
  func.func @_varnet_kernel(%arg0: i32, %arg1: memref<16x128xbf16, #tpu.memory_space<vmem>>, %arg2: memref<128x128xbf16, #tpu.memory_space<vmem>>, %arg3: memref<1x128xf32, #tpu.memory_space<vmem>>, %arg4: memref<128x128xbf16, #tpu.memory_space<vmem>>, %arg5: memref<1x128xf32, #tpu.memory_space<vmem>>, %arg6: memref<16x128xf32, #tpu.memory_space<vmem>>) attributes {dimension_semantics = [#tpu.dimension_semantics<parallel>], iteration_bounds = array<i64: 1>, scalar_prefetch = 0 : i64, scratch_operands = 0 : i64, tpu.core_type = #tpu.core_type<tc>, window_params = [{transform_indices = @transform_0, window_bounds = array<i64: 16, 128>}, {pipeline_mode = #tpu.pipeline_mode<synchronous>, transform_indices = @transform_1, window_bounds = array<i64: 128, 128>}, {pipeline_mode = #tpu.pipeline_mode<synchronous>, transform_indices = @transform_2, window_bounds = array<i64: 1, 128>}, {pipeline_mode = #tpu.pipeline_mode<synchronous>, transform_indices = @transform_3, window_bounds = array<i64: 128, 128>}, {pipeline_mode = #tpu.pipeline_mode<synchronous>, transform_indices = @transform_4, window_bounds = array<i64: 1, 128>}, {transform_indices = @transform_5, window_bounds = array<i64: 16, 128>}]} {
    %c0 = arith.constant 0 : index
    %c0_0 = arith.constant 0 : index
    %0 = vector.load %arg1[%c0, %c0_0] : memref<16x128xbf16, #tpu.memory_space<vmem>>, vector<16x128xbf16>
    %c0_1 = arith.constant 0 : index
    %c0_2 = arith.constant 0 : index
    %1 = vector.load %arg2[%c0_1, %c0_2] : memref<128x128xbf16, #tpu.memory_space<vmem>>, vector<128x128xbf16>
    %cst = arith.constant dense<0.000000e+00> : vector<16x128xf32>
    %2 = tpu.matmul %0, %1, %cst {dimension_numbers = #tpu.dot_dimension_numbers<[1], [0], [0], [1], [0, 0, 1, 1], [], []>} : vector<16x128xbf16>, vector<128x128xbf16>, vector<16x128xf32> -> vector<16x128xf32>
    %c0_3 = arith.constant 0 : index
    %c0_4 = arith.constant 0 : index
    %3 = vector.load %arg3[%c0_3, %c0_4] : memref<1x128xf32, #tpu.memory_space<vmem>>, vector<1x128xf32>
    %4 = vector.broadcast %3 : vector<1x128xf32> to vector<16x128xf32>
    %5 = arith.addf %2, %4 : vector<16x128xf32>
    %cst_5 = arith.constant 0.000000e+00 : f32
    %6 = vector.broadcast %cst_5 : f32 to vector<16x128xf32>
    %7 = arith.maximumf %5, %6 : vector<16x128xf32>
    %8 = arith.truncf %7 : vector<16x128xf32> to vector<16x128xbf16>
    %c0_6 = arith.constant 0 : index
    %c0_7 = arith.constant 0 : index
    %9 = vector.load %arg4[%c0_6, %c0_7] : memref<128x128xbf16, #tpu.memory_space<vmem>>, vector<128x128xbf16>
    %cst_8 = arith.constant dense<0.000000e+00> : vector<16x128xf32>
    %10 = tpu.matmul %8, %9, %cst_8 {dimension_numbers = #tpu.dot_dimension_numbers<[1], [0], [0], [1], [0, 0, 1, 1], [], []>} : vector<16x128xbf16>, vector<128x128xbf16>, vector<16x128xf32> -> vector<16x128xf32>
    %c0_9 = arith.constant 0 : index
    %c0_10 = arith.constant 0 : index
    %11 = vector.load %arg5[%c0_9, %c0_10] : memref<1x128xf32, #tpu.memory_space<vmem>>, vector<1x128xf32>
    %12 = vector.broadcast %11 : vector<1x128xf32> to vector<16x128xf32>
    %13 = arith.addf %10, %12 : vector<16x128xf32>
    %cst_11 = arith.constant 0.000000e+00 : f32
    %14 = vector.broadcast %cst_11 : f32 to vector<16x128xf32>
    %15 = arith.minimumf %13, %14 : vector<16x128xf32>
    %16 = math.exp %15 : vector<16x128xf32>
    %cst_12 = arith.constant 1.000000e+00 : f32
    %17 = vector.broadcast %cst_12 : f32 to vector<16x128xf32>
    %18 = arith.subf %16, %17 : vector<16x128xf32>
    %cst_13 = arith.constant 0.000000e+00 : f32
    %19 = vector.broadcast %cst_13 : f32 to vector<16x128xf32>
    %20 = arith.subf %19, %18 : vector<16x128xf32>
    %cst_14 = arith.constant 0.000000e+00 : f32
    %21 = vector.broadcast %cst_14 : f32 to vector<16x128xf32>
    %22 = arith.cmpf ogt, %13, %21 : vector<16x128xf32>
    %23 = arith.select %22, %13, %20 : vector<16x128xi1>, vector<16x128xf32>
    %c0_15 = arith.constant 0 : index
    %c0_16 = arith.constant 0 : index
    %24 = vector.load %arg6[%c0_15, %c0_16] : memref<16x128xf32, #tpu.memory_space<vmem>>, vector<16x128xf32>
    tpu.vector_store %arg6[%c0_15, %c0_16], %23 {strides = array<i32>} : memref<16x128xf32, #tpu.memory_space<vmem>>, vector<16x128xf32>,
    return
  }
  func.func @transform_0(%arg0: i32) -> (i32, i32) {
    %c0_i32 = arith.constant 0 : i32
    %c0_i32_0 = arith.constant 0 : i32
    return %arg0, %c0_i32 : i32, i32
  }
  func.func @transform_1(%arg0: i32) -> (i32, i32) {
    %c0_i32 = arith.constant 0 : i32
    %c0_i32_0 = arith.constant 0 : i32
    %c0_i32_1 = arith.constant 0 : i32
    return %c0_i32, %c0_i32_0 : i32, i32
  }
  func.func @transform_2(%arg0: i32) -> (i32, i32) {
    %c0_i32 = arith.constant 0 : i32
    %c0_i32_0 = arith.constant 0 : i32
    %c0_i32_1 = arith.constant 0 : i32
    return %c0_i32, %c0_i32_0 : i32, i32
  }
  func.func @transform_3(%arg0: i32) -> (i32, i32) {
    %c0_i32 = arith.constant 0 : i32
    %c0_i32_0 = arith.constant 0 : i32
    %c0_i32_1 = arith.constant 0 : i32
    return %c0_i32, %c0_i32_0 : i32, i32
  }
  func.func @transform_4(%arg0: i32) -> (i32, i32) {
    %c0_i32 = arith.constant 0 : i32
    %c0_i32_0 = arith.constant 0 : i32
    %c0_i32_1 = arith.constant 0 : i32
    return %c0_i32, %c0_i32_0 : i32, i32
  }
  func.func @transform_5(%arg0: i32) -> (i32, i32) {
    %c0_i32 = arith.constant 0 : i32
    %c0_i32_0 = arith.constant 0 : i32
    return %arg0, %c0_i32 : i32, i32
  }
}

</mosaic_0001>

<bundles_post_ra>
// kernel: tpu_custom_call.1
= control target key start
LH: loop header
LB: loop body
LE: loop exit
PB: predicated region body
PF: predicated region fallthrough
CT: control target
= control target key end

     0   :  { %10 = vsyncpa [#allocation3], 0  ;;  %s538_s0 = inlined_call_operand.hbm [shape: bf16[16,128], index: 0, kind: input, shape index: {}]   ;;  %s539_s1 = inlined_call_operand.hbm [shape: bf16[128,128], index: 1, kind: input, shape index: {}]   ;;  %s540_s2 = inlined_call_operand.vmem [shape: f32[1,128], index: 2, kind: input, shape index: {}]   ;;  %s541_s3 = inlined_call_operand.hbm [shape: bf16[128,128], index: 3, kind: input, shape index: {}]   ;;  %s542_s4 = inlined_call_operand.vmem [shape: f32[1,128], index: 4, kind: input, shape index: {}]   ;;  %s543_s5 = inlined_call_operand.hbm [shape: f32[16,128], index: 5, kind: output, shape index: {}]  }
   0x1   :  { %11 = vsyncpa [#allocation6], 0 }
   0x2   :  { %12 = vsyncpa [#allocation4], 0  ;;  %s30_s20 = sshll.u32 %s539_s1, 4  ;;  %s482_s21 = smov [#allocation5]   ;;  %s31_s20 = int_to_ptr.hbm [resolvable:$true] %s30_s20 }
   0x3   :  { %s32_s22 = sshll.u32 %s482_s21, 4  ;;  %s17_s25 = sshll.u32 %s538_s0, 4  ;;  %s33_s22 = int_to_ptr.vmem [resolvable:$true] %s32_s22  ;;  %s18_s25 = int_to_ptr.hbm [resolvable:$true] %s17_s25 }
   0x4   :  { %s483_s26 = smov 64   ;;  %s484_s27 = smov 4  }
   0x5   :  { %38 = dma.hbm_to_vmem [thread:$0]  %s31_s20, 1024, %s33_s22, [#allocation6], %s483_s26, %s483_s26, %s484_s27  }
   0x6   :  { %s485_s28 = smov [#allocation2]   ;;  %s45_s7 = sshll.u32 %s541_s3, 4  ;;  %s46_s7 = int_to_ptr.hbm [resolvable:$true] %s45_s7 }
   0x7   :  { %s19_s29 = sshll.u32 %s485_s28, 4  ;;  %s486_s1 = smov [#allocation7]   ;;  %s20_s29 = int_to_ptr.vmem [resolvable:$true] %s19_s29 }
   0x8   :  { %25 = dma.hbm_to_vmem [thread:$0]  %s18_s25, 128, %s20_s29, [#allocation3], %s483_s26, %s483_s26, %s484_s27  }
   0x9   :  { %s47_s8 = sshll.u32 %s486_s1, 4  ;;  %s48_s8 = int_to_ptr.vmem [resolvable:$true] %s47_s8 }
   0xa   :  { %53 = dma.hbm_to_vmem [thread:$0]  %s46_s7, 1024, %s48_s8, [#allocation6], %s483_s26, %s483_s26, %s484_s27  }
   0xb   :  { %476 = dma.done.wait [#allocation3], 128  }
   0xc   :  { %477 = vsyncadd [#allocation3], 4294967168 }
   0xd   :  { %478 = dma.done.wait [#allocation6], 2048  }
   0xe   :  { %479 = vsyncadd [#allocation6], 4294965248  ;;  %v357_v0 = vld [vmem:[#allocation5 + $0x38] sm:$0xff]  ;;  %v356_v1 = vld [vmem:[#allocation5 + $0x30] sm:$0xff]  ;;  %s265_s13 = sshll.u32 %s543_s5, 4  ;;  %s488_s14 = smov 128   ;;  %s266_s13 = int_to_ptr.hbm [resolvable:$true] %s265_s13 }
   0xf   :  { %144 = vmatpush.bf16.msra.mxu0 %v357_v0  ;;  %v365_v2 = vld [vmem:[#allocation7 + $0x38] sm:$0xff]  ;;  %v364_v3 = vld [vmem:[#allocation7 + $0x30] sm:$0xff]  ;;  %v355_v4 = vld [vmem:[#allocation5 + $0x28] sm:$0xff]  ;;  %s489_s15 = smov 8  }
  0x10   :  { %229 = vmatpush.bf16.msra.mxu1 %v365_v2  ;;  %v363_v5 = vld [vmem:[#allocation7 + $0x28] sm:$0xff]  ;;  %v354_v6 = vld [vmem:[#allocation5 + $0x20] sm:$0xff]  ;;  %v353_v8 = vld [vmem:[#allocation5 + $0x18] sm:$0xff] }
  0x11   :  { %v362_v7 = vld [vmem:[#allocation7 + $0x20] sm:$0xff]  ;;  %v352_v9 = vld [vmem:[#allocation5 + $0x10] sm:$0xff]  ;;  %v351_v10 = vld [vmem:[#allocation5 + $0x8] sm:$0xff] }
  0x12   :  { %v350_v11 = vld [vmem:[#allocation5] sm:$0xff]  ;;  %v349_v12 = vld [vmem:[#allocation2] sm:$0xff]  ;;  %v360_v14 = vld [vmem:[#allocation7 + $0x10] sm:$0xff] }
  0x13   :  { %145 = vmatpush.bf16.msra.mxu0 %v356_v1  ;;  %v361_v13 = vld [vmem:[#allocation7 + $0x18] sm:$0xff]  ;;  %v359_v15 = vld [vmem:[#allocation7 + $0x8] sm:$0xff]  ;;  %v358_v16 = vld [vmem:[#allocation7] sm:$0xff] }
  0x14   :  { %230 = vmatpush.bf16.msra.mxu1 %v364_v3  ;;  %v374_v18 = vld [vmem:[%s540_s2] ss:$0 sm:$0xff]  ;;  %s487_s2 = smov [#allocation8]  }
  0x15   :  { %v375_v25 = vld [vmem:[%s542_s4] ss:$0 sm:$0xff]  ;;  %s263_s11 = sshll.u32 %s487_s2, 4  ;;  %s264_s11 = int_to_ptr.vmem [resolvable:$true] %s263_s11 }
  0x17   :  { %146 = vmatpush.bf16.msra.mxu0 %v355_v4 }
  0x18   :  { %231 = vmatpush.bf16.msra.mxu1 %v363_v5 }
  0x1b   :  { %147 = vmatpush.bf16.msra.mxu0 %v354_v6 }
  0x1c   :  { %232 = vmatpush.bf16.msra.mxu1 %v362_v7 }
  0x1f   :  { %148 = vmatpush.bf16.msra.mxu0 %v353_v8 }
  0x20   :  { %233 = vmatpush.bf16.msra.mxu1 %v361_v13 }
  0x23   :  { %149 = vmatpush.bf16.msra.mxu0 %v352_v9 }
  0x24   :  { %234 = vmatpush.bf16.msra.mxu1 %v360_v14 }
  0x27   :  { %150 = vmatpush.bf16.msra.mxu0 %v351_v10 }
  0x28   :  { %235 = vmatpush.bf16.msra.mxu1 %v359_v15 }
  0x2b   :  { %151 = vmatpush.bf16.msra.mxu0 %v350_v11 }
  0x2c   :  { %236 = vmatpush.bf16.msra.mxu1 %v358_v16 }
  0x2e   :  { %152 = vmatmul.bf16.vlgmr.msra.gmra.mxu0 %v349_v12 }
  0xab   :  { %v153_v17 = vpop.f32.mrf.mxu0 }
  0xac   :  { %v154_v19 = vadd.f32 %v374_v18, %v153_v17 }
  0xae   :  { %v158_v22 = vmax.f32 %v154_v19, 0.0 }
  0xb3   :  { %v155_v20 = vpop.f32.mrf.mxu0 }
  0xb4   :  { %v156_v21 = vadd.f32 %v374_v18, %v155_v20 }
  0xb6   :  { %v159_v23 = vmax.f32 %v156_v21, 0.0 }
  0xb8   :  { %v160_v24 = vpack.c.bf16 %v159_v23, %v158_v22 }
  0xba   :  { %237 = vmatmul.bf16.vlgmr.msra.gmra.mxu1 %v160_v24 }
 0x137   :  { %v238_v26 = vpop.f32.mrf.mxu1 }
 0x138   :  { %v239_v27 = vadd.f32 %v375_v25, %v238_v26 }
 0x13a   :  { %v243_v28 = vmin.f32 %v239_v27, 0.0  ;;  %vm253_vm0 = vcmp.gt.f32.partialorder %v239_v27, 0.0 }
 0x13c   :  { %v245_v29 = vmul.f32 1.442695, %v243_v28 }
 0x13e   :  { %376 = vpow2.f32 %v245_v29 }
 0x13f   :  { %v240_v30 = vpop.f32.mrf.mxu1 }
 0x140   :  { %v241_v31 = vadd.f32 %v375_v25, %v240_v30 }
 0x142   :  { %v244_v32 = vmin.f32 %v241_v31, 0.0  ;;  %vm254_vm1 = vcmp.gt.f32.partialorder %v241_v31, 0.0 }
 0x144   :  { %v377_v33 = vpop.eup %376  ;;  %v247_v34 = vmul.f32 1.442695, %v244_v32 }
 0x145   :  { %v347_v35 = vadd.f32 -1.0, %v377_v33 }
 0x146   :  { %378 = vpow2.f32 %v247_v34 }
 0x147   :  { %v251_v36 = vsub.f32 0.0, %v347_v35 }
 0x149   :  { %v255_v37 = vsel %vm253_vm0, %v239_v27, %v251_v36 }
 0x14a   :  { %257 = vst [vmem:[#allocation8] sm:$0xff] %v255_v37 }
 0x14c   :  { %v379_v38 = vpop.eup %378 }
 0x14d   :  { %v348_v39 = vadd.f32 -1.0, %v379_v38 }
 0x14f   :  { %v252_v40 = vsub.f32 0.0, %v348_v39 }
 0x151   :  { %v256_v41 = vsel %vm254_vm1, %v241_v31, %v252_v40 }
 0x152   :  { %258 = vst [vmem:[#allocation8 + $0x8] sm:$0xff] %v256_v41 }
 0x153   :  { %271 = dma.vmem_to_hbm [thread:$0]  %s264_s11, 256, %s266_s13, [#allocation4], %s488_s14, %s488_s14, %s489_s15  }
 0x154   :  { %480 = dma.done.wait [#allocation4], 256  }
 0x155   :  { %481 = vsyncadd [#allocation4], 4294967040 }
 0x156   :  { %276 = vsyncpa [#allocation3], 1 }
 0x157   :  { %277 = vsyncpa [#allocation6], 1 }
 0x158   :  { %278 = vsyncpa [#allocation4], 1 }

</bundles_post_ra>
